<compile_context>
chip_gen: v6e
topology: v6e:2x2x1
jax: 0.10.0
libtpu: 0.0.40
codegen_flags: <defaults>
</compile_context>

<pallas_src>
import functools

import numpy as np
import jax
import jax.numpy as jnp
from jax.experimental import pallas as pl
from jax.experimental.pallas import tpu as pltpu

_LOG_CLIP = float(np.log(100.0))  # clip(exp(m), max=100) == exp(min(m, ln 100))
_HALO = 8  # sublane-aligned halo block; only its last row (frame j*tl - 1) used


# ----------------------------------------------------------------------------
# Setup glue: deterministic IMDCT basis + cosine window (matches vocos.IMDCT)
# ----------------------------------------------------------------------------
def build_imdct_basis(frame_len: int) -> np.ndarray:
    """Returns basis (N, 2N) s.t. frames = coeffs @ basis reproduces vocos
    IMDCT (before windowing / overlap-add)."""
    N = frame_len // 2
    n0 = (N + 1) / 2.0
    X = np.eye(N, dtype=np.float64)
    Y = np.zeros((N, 2 * N), dtype=np.complex128)
    Y[:, :N] = X
    Y[:, N:] = -np.conj(X[:, ::-1])  # -conj(flip(X, -1))
    pre = np.exp(1j * np.pi * n0 * np.arange(2 * N) / N)
    post = np.exp(1j * np.pi * (np.arange(2 * N) + n0) / (2 * N))
    y = np.fft.ifft(Y * pre[None, :], axis=-1)
    y = np.real(y * post[None, :]) * np.sqrt(N) * np.sqrt(2.0)
    return y.astype(np.float32)  # (N, 2N)


def cosine_window(frame_len: int) -> np.ndarray:
    # scipy.signal.windows.cosine: w[n] = sin(pi * (n + 0.5) / M)
    n = np.arange(frame_len, dtype=np.float64)
    return np.sin(np.pi * (n + 0.5) / frame_len).astype(np.float32)


def _round_up(x: int, m: int) -> int:
    return ((x + m - 1) // m) * m


def _device_defaults():
    """Per-TPU-generation (tile_l, vmem_limit_bytes) defaults."""
    try:
        kind = jax.devices()[0].device_kind.lower()
    except Exception:  # pragma: no cover - defensive
        kind = ""
    if "v5 lite" in kind or "v5e" in kind or "v5lite" in kind:
        return 128, None                     # fit v5e's 16 MiB scoped default
    if "v7" in kind:
        return 512, 48 * 1024 * 1024         # 64 MiB physical VMEM on v7x
    return 256, None                         # v6e / default


# ----------------------------------------------------------------------------
# Pallas kernel: fused linear + exp/cos + fused IMDCT matmul + overlap-add
# ----------------------------------------------------------------------------
def _imdct_cos_head_kernel(x_ref, xprev_ref, w_ref, b_ref, basisw_ref, out_ref,
                           *, n_half, n_frames, tl, mxu_dtype):
    j = pl.program_id(1)  # frame-tile index ("parallel": no cross-tile state)

    def head_coeffs(xv):
        # Fused linear (.., H) @ (H, 2N) in mxu_dtype, f32 accumulation + f32
        # bias; MDCT coeffs = clip(exp(m), 100) * cos(p) with clip in log
        # domain (no inf intermediates).
        h = jnp.dot(xv.astype(mxu_dtype), w_ref[...],
                    preferred_element_type=jnp.float32) + b_ref[...]
        m = h[:, :n_half]
        p = h[:, n_half:]
        return jnp.exp(jnp.minimum(m, _LOG_CLIP)) * jnp.cos(p)

    # ---- main tile: frames [j*tl, j*tl + tl) -------------------------------
    coeff = head_coeffs(x_ref[0])                                    # (TL, N)
    # Mask frames >= L: with no host-side padding the tail rows of the last
    # tile are garbage (and even zero x rows would give nonzero coeff via the
    # bias).  jnp.where is a select, so garbage/NaN never propagates.
    row = jax.lax.broadcasted_iota(jnp.int32, (tl, 1), 0)
    coeff = jnp.where(row + j * tl < n_frames, coeff, 0.0)
    # Fused IMDCT matmul against the window-folded (N, 2N) basis.
    y = jnp.dot(coeff.astype(mxu_dtype), basisw_ref[...],
                preferred_element_type=jnp.float32)                  # (TL, 2N)
    first = y[:, :n_half]
    second = y[:, n_half:]

    # ---- halo: recompute frame j*tl - 1 (last row of the 8-frame halo) so
    # the tile is self-contained and the frame axis can stay "parallel".
    cprev = head_coeffs(xprev_ref[0, _HALO - 1:_HALO, :])            # (1, N)
    yprev = jnp.dot(cprev.astype(mxu_dtype), basisw_ref[...],
                    preferred_element_type=jnp.float32)              # (1, 2N)
    prev_second = jnp.where(j > 0, yprev[:, n_half:], 0.0)           # (1, N)

    # ---- overlap-add (hop = N): out[r] = first[r] + second[r-1] ------------
    # pltpu.roll puts the one-frame shift on the XLU; row 0 of the rolled
    # tensor (wrapped second[tl-1]) is replaced by the halo contribution, then
    # one unmasked, aligned (tl, N) store.
    shifted = pltpu.roll(second, shift=1, axis=0)
    shifted = jnp.where(row == 0, prev_second, shifted)
    out_ref[0, :, :] = (first + shifted).astype(out_ref.dtype)


def imdct_cos_head(x, weight, bias, basis, window, padding: str = "same",
                   clip_audio: bool = False, tile_l=None,
                   mxu_dtype=jnp.bfloat16, vmem_limit_bytes=None):
    """x: (B, L, H); weight: (frame_len, H); bias: (frame_len,);
    basis: (N, 2N); window: (2N,). Returns audio (B, T)."""
    B, L, H = x.shape
    frame_len = weight.shape[0]
    N = frame_len // 2
    assert basis.shape == (N, frame_len) and window.shape == (frame_len,)

    dflt_tl, dflt_vmem = _device_defaults()
    if tile_l is None:
        tile_l = dflt_tl
    if vmem_limit_bytes is None:
        vmem_limit_bytes = dflt_vmem

    # Frame-tile size: multiple of 8 sublanes; tiles must cover L+1 rows (row
    # L holds the trailing half frame of the overlap-add).
    tl = _round_up(min(int(tile_l), _round_up(L + 1, 8)), 8)
    nt = pl.cdiv(L + 1, tl)
    hb = tl // _HALO  # frame-tile size measured in halo blocks

    # Parameter plumbing (one-time glue): fused weight, window-folded basis.
    w = jnp.asarray(weight, jnp.float32).T.astype(mxu_dtype)            # (H, 2N)
    b = jnp.asarray(bias, jnp.float32).reshape(1, frame_len)            # (1, 2N)
    basis_w = (jnp.asarray(basis, jnp.float32)
               * jnp.asarray(window, jnp.float32)[None, :]).astype(mxu_dtype)

    kernel = functools.partial(_imdct_cos_head_kernel, n_half=N, n_frames=L,
                               tl=tl, mxu_dtype=mxu_dtype)

    cp = dict(dimension_semantics=("parallel", "parallel"))
    if vmem_limit_bytes is not None:
        cp["vmem_limit_bytes"] = int(vmem_limit_bytes)

    out = pl.pallas_call(
        kernel,
        out_shape=jax.ShapeDtypeStruct((B, L + 1, N), jnp.float32),
        grid=(B, nt),
        in_specs=[
            # x tile (double-buffered, pipelined against compute).
            pl.BlockSpec((1, tl, H), lambda bb, jj: (bb, jj, 0)),
            # 8-frame halo ending just before the tile (only its last row is
            # used; clamped to block 0 at jj == 0 where it is zeroed anyway).
            pl.BlockSpec((1, _HALO, H),
                         lambda bb, jj: (bb, jnp.maximum(jj * hb - 1, 0), 0)),
            # Grid-invariant parameters: constant index_map -> single buffer.
            pl.BlockSpec((H, frame_len), lambda bb, jj: (0, 0),
                         pipeline_mode=pl.Buffered(1)),
            pl.BlockSpec((1, frame_len), lambda bb, jj: (0, 0),
                         pipeline_mode=pl.Buffered(1)),
            pl.BlockSpec((N, frame_len), lambda bb, jj: (0, 0),
                         pipeline_mode=pl.Buffered(1)),
        ],
        out_specs=pl.BlockSpec((1, tl, N), lambda bb, jj: (bb, jj, 0)),
        compiler_params=pltpu.CompilerParams(**cp),
    )(x, x, w, b, basis_w)

    # NOTE: for small frame_len (N < 128) the output's last dim is below lane
    # width and stores are masked; production vocos has N = 640 = 5 * 128.
    audio = out.reshape(B, (L + 1) * N)
    pad = frame_len // 2 if padding == "center" else frame_len // 4
    audio = audio[:, pad:(L + 1) * N - pad]
    if clip_audio:
        # TODO(synk): the PyTorch reference clips the pre-IMDCT tensor `x`
        # (shape mismatch / likely a reference bug); we clip the audio
        # instead. Default clip_audio=False, so this branch is not exercised.
        audio = jnp.clip(audio, -1.0, 1.0)
    return audio


# ----------------------------------------------------------------------------
# Pure-JAX reference (same math, no Pallas) for a correctness check.
# ----------------------------------------------------------------------------
def reference(x, weight, bias, basis, window, padding="same"):
    B, L, H = x.shape
    frame_len = weight.shape[0]
    N = frame_len // 2
    h = jnp.dot(x, weight.T, preferred_element_type=jnp.float32) + bias
    m, p = h[..., :N], h[..., N:]
    coeff = jnp.minimum(jnp.exp(m), 100.0) * jnp.cos(p)
    y = jnp.dot(coeff, basis, preferred_element_type=jnp.float32) * window  # (B, L, 2N)
    audio = jnp.zeros((B, (L + 1) * N), jnp.float32)
    audio = audio.at[:, :L * N].add(y[:, :, :N].reshape(B, L * N))
    audio = audio.at[:, N:].add(y[:, :, N:].reshape(B, L * N))
    pad = frame_len // 2 if padding == "center" else frame_len // 4
    return audio[:, pad:(L + 1) * N - pad]


if __name__ == "__main__":
    # Small deterministic config: dim=32, mdct_frame_len=64, B=2, L=8.
    B, L, H = 2, 8, 32
    frame_len = 64
    N = frame_len // 2

    key = jax.random.PRNGKey(0)
    kx, kw, kb = jax.random.split(key, 3)
    x = jax.random.normal(kx, (B, L, H), jnp.float32)
    weight = jax.random.normal(kw, (frame_len, H), jnp.float32) * 0.05  # nn.Linear weight
    bias = jax.random.normal(kb, (frame_len,), jnp.float32) * 0.05      # nn.Linear bias

    basis = jnp.asarray(build_imdct_basis(frame_len))   # (N, 2N)
    window = jnp.asarray(cosine_window(frame_len))      # (2N,)

    ref = jax.block_until_ready(reference(x, weight, bias, basis, window, "same"))

    # 1) f32 MXU path, single frame tile.
    audio = jax.block_until_ready(
        imdct_cos_head(x, weight, bias, basis, window, padding="same",
                       mxu_dtype=jnp.float32))
    assert audio.shape == (B, L * N), audio.shape
    np.testing.assert_allclose(np.asarray(audio), np.asarray(ref),
                               rtol=2e-3, atol=2e-3)

    # 2) f32, tiny frame tile -> exercises the multi-tile halo path (parallel
    #    frame axis, no carry) and the ragged-edge masking.
    audio_t = jax.block_until_ready(
        imdct_cos_head(x, weight, bias, basis, window, padding="same",
                       tile_l=8, mxu_dtype=jnp.float32))
    np.testing.assert_allclose(np.asarray(audio_t), np.asarray(ref),
                               rtol=2e-3, atol=2e-3)

    # 3) default path: bf16 MXU operands, f32 accumulation / elementwise.
    audio_bf = jax.block_until_ready(
        imdct_cos_head(x, weight, bias, basis, window, padding="same"))
    rel_l2 = (np.linalg.norm(np.asarray(audio_bf) - np.asarray(ref))
              / np.linalg.norm(np.asarray(ref)))
    assert rel_l2 < 5e-2, f"bf16 relative L2 error too large: {rel_l2}"

    print("KERNEL_OK")
</pallas_src>

<mosaic_0001>
module attributes {stable_mosaic.version = 11 : i64} {
  func.func @_imdct_cos_head_kernel(%arg0: i32, %arg1: i32, %arg2: memref<1x16x32xf32, #tpu.memory_space<vmem>>, %arg3: memref<1x8x32xf32, #tpu.memory_space<vmem>>, %arg4: memref<32x64xf32, #tpu.memory_space<vmem>>, %arg5: memref<1x64xf32, #tpu.memory_space<vmem>>, %arg6: memref<32x64xf32, #tpu.memory_space<vmem>>, %arg7: memref<1x16x32xf32, #tpu.memory_space<vmem>>) attributes {dimension_semantics = [#tpu.dimension_semantics<parallel>, #tpu.dimension_semantics<parallel>], iteration_bounds = array<i64: 2, 1>, scalar_prefetch = 0 : i64, scratch_operands = 0 : i64, tpu.core_type = #tpu.core_type<tc>, window_params = [{transform_indices = @transform_0, window_bounds = array<i64: 1, 16, 32>}, {transform_indices = @transform_1, window_bounds = array<i64: 1, 8, 32>}, {pipeline_mode = #tpu.pipeline_mode<synchronous>, transform_indices = @transform_2, window_bounds = array<i64: 32, 64>}, {pipeline_mode = #tpu.pipeline_mode<synchronous>, transform_indices = @transform_3, window_bounds = array<i64: 1, 64>}, {pipeline_mode = #tpu.pipeline_mode<synchronous>, transform_indices = @transform_4, window_bounds = array<i64: 32, 64>}, {transform_indices = @transform_5, window_bounds = array<i64: 1, 16, 32>}]} {
    %c0 = arith.constant 0 : index
    %c0_0 = arith.constant 0 : index
    %c0_1 = arith.constant 0 : index
    %0 = vector.load %arg2[%c0, %c0_0, %c0_1] : memref<1x16x32xf32, #tpu.memory_space<vmem>>, vector<1x16x32xf32>
    %1 = vector.shape_cast %0 : vector<1x16x32xf32> to vector<16x32xf32>
    %c0_2 = arith.constant 0 : index
    %c0_3 = arith.constant 0 : index
    %2 = vector.load %arg4[%c0_2, %c0_3] : memref<32x64xf32, #tpu.memory_space<vmem>>, vector<32x64xf32>
    %cst = arith.constant dense<0.000000e+00> : vector<16x64xf32>
    %3 = tpu.matmul %1, %2, %cst {dimension_numbers = #tpu.dot_dimension_numbers<[1], [0], [0], [1], [0, 0, 1, 1], [], []>} : vector<16x32xf32>, vector<32x64xf32>, vector<16x64xf32> -> vector<16x64xf32>
    %c0_4 = arith.constant 0 : index
    %c0_5 = arith.constant 0 : index
    %4 = vector.load %arg5[%c0_4, %c0_5] : memref<1x64xf32, #tpu.memory_space<vmem>>, vector<1x64xf32>
    %5 = vector.broadcast %4 : vector<1x64xf32> to vector<16x64xf32>
    %6 = arith.addf %3, %5 : vector<16x64xf32>
    %7 = vector.extract_strided_slice %6 {offsets = [0, 0], sizes = [16, 32], strides = [1, 1]} : vector<16x64xf32> to vector<16x32xf32>
    %8 = vector.extract_strided_slice %6 {offsets = [0, 32], sizes = [16, 32], strides = [1, 1]} : vector<16x64xf32> to vector<16x32xf32>
    %cst_6 = arith.constant 4.60517025 : f32
    %9 = vector.broadcast %cst_6 : f32 to vector<16x32xf32>
    %10 = arith.minimumf %7, %9 : vector<16x32xf32>
    %11 = math.exp %10 : vector<16x32xf32>
    %12 = math.cos %8 : vector<16x32xf32>
    %13 = arith.mulf %11, %12 : vector<16x32xf32>
    %14 = tpu.iota {dimensions = array<i32: 0>} : vector<16x1xi32>
    %c16_i32 = arith.constant 16 : i32
    %15 = arith.muli %arg1, %c16_i32 : i32
    %16 = vector.broadcast %15 : i32 to vector<16x1xi32>
    %17 = arith.addi %14, %16 : vector<16x1xi32>
    %c8_i32 = arith.constant 8 : i32
    %18 = vector.broadcast %c8_i32 : i32 to vector<16x1xi32>
    %19 = arith.cmpi slt, %17, %18 : vector<16x1xi32>
    %cst_7 = arith.constant 0.000000e+00 : f32
    %20 = vector.shape_cast %19 : vector<16x1xi1> to vector<16x1xi1>
    %21 = vector.broadcast %20 : vector<16x1xi1> to vector<16x32xi1>
    %22 = vector.broadcast %cst_7 : f32 to vector<16x32xf32>
    %23 = arith.select %21, %13, %22 : vector<16x32xi1>, vector<16x32xf32>
    %c0_8 = arith.constant 0 : index
    %c0_9 = arith.constant 0 : index
    %24 = vector.load %arg6[%c0_8, %c0_9] : memref<32x64xf32, #tpu.memory_space<vmem>>, vector<32x64xf32>
    %cst_10 = arith.constant dense<0.000000e+00> : vector<16x64xf32>
    %25 = tpu.matmul %23, %24, %cst_10 {dimension_numbers = #tpu.dot_dimension_numbers<[1], [0], [0], [1], [0, 0, 1, 1], [], []>} : vector<16x32xf32>, vector<32x64xf32>, vector<16x64xf32> -> vector<16x64xf32>
    %26 = vector.extract_strided_slice %25 {offsets = [0, 0], sizes = [16, 32], strides = [1, 1]} : vector<16x64xf32> to vector<16x32xf32>
    %27 = vector.extract_strided_slice %25 {offsets = [0, 32], sizes = [16, 32], strides = [1, 1]} : vector<16x64xf32> to vector<16x32xf32>
    %c0_11 = arith.constant 0 : index
    %c7 = arith.constant 7 : index
    %c0_12 = arith.constant 0 : index
    %28 = vector.load %arg3[%c0_11, %c7, %c0_12] : memref<1x8x32xf32, #tpu.memory_space<vmem>>, vector<1x1x32xf32>
    %29 = vector.shape_cast %28 : vector<1x1x32xf32> to vector<1x32xf32>
    %c0_13 = arith.constant 0 : index
    %c0_14 = arith.constant 0 : index
    %30 = vector.load %arg4[%c0_13, %c0_14] : memref<32x64xf32, #tpu.memory_space<vmem>>, vector<32x64xf32>
    %cst_15 = arith.constant dense<0.000000e+00> : vector<1x64xf32>
    %31 = tpu.matmul %29, %30, %cst_15 {dimension_numbers = #tpu.dot_dimension_numbers<[1], [0], [0], [1], [0, 0, 1, 1], [], []>} : vector<1x32xf32>, vector<32x64xf32>, vector<1x64xf32> -> vector<1x64xf32>
    %c0_16 = arith.constant 0 : index
    %c0_17 = arith.constant 0 : index
    %32 = vector.load %arg5[%c0_16, %c0_17] : memref<1x64xf32, #tpu.memory_space<vmem>>, vector<1x64xf32>
    %33 = arith.addf %31, %32 : vector<1x64xf32>
    %34 = vector.extract_strided_slice %33 {offsets = [0, 0], sizes = [1, 32], strides = [1, 1]} : vector<1x64xf32> to vector<1x32xf32>
    %35 = vector.extract_strided_slice %33 {offsets = [0, 32], sizes = [1, 32], strides = [1, 1]} : vector<1x64xf32> to vector<1x32xf32>
    %cst_18 = arith.constant 4.60517025 : f32
    %36 = vector.broadcast %cst_18 : f32 to vector<1x32xf32>
    %37 = arith.minimumf %34, %36 : vector<1x32xf32>
    %38 = math.exp %37 : vector<1x32xf32>
    %39 = math.cos %35 : vector<1x32xf32>
    %40 = arith.mulf %38, %39 : vector<1x32xf32>
    %c0_19 = arith.constant 0 : index
    %c0_20 = arith.constant 0 : index
    %41 = vector.load %arg6[%c0_19, %c0_20] : memref<32x64xf32, #tpu.memory_space<vmem>>, vector<32x64xf32>
    %cst_21 = arith.constant dense<0.000000e+00> : vector<1x64xf32>
    %42 = tpu.matmul %40, %41, %cst_21 {dimension_numbers = #tpu.dot_dimension_numbers<[1], [0], [0], [1], [0, 0, 1, 1], [], []>} : vector<1x32xf32>, vector<32x64xf32>, vector<1x64xf32> -> vector<1x64xf32>
    %c0_i32 = arith.constant 0 : i32
    %43 = arith.cmpi sgt, %arg1, %c0_i32 : i32
    %44 = vector.extract_strided_slice %42 {offsets = [0, 32], sizes = [1, 32], strides = [1, 1]} : vector<1x64xf32> to vector<1x32xf32>
    %cst_22 = arith.constant 0.000000e+00 : f32
    %45 = vector.broadcast %cst_22 : f32 to vector<1x32xf32>
    %46 = arith.select %43, %44, %45 : vector<1x32xf32>
    %c1_i32 = arith.constant 1 : i32
    %47 = tpu.dynamic_rotate %27 by %c1_i32 dim 0 : vector<16x32xf32>, i32 -> vector<16x32xf32>
    %c0_i32_23 = arith.constant 0 : i32
    %48 = vector.broadcast %c0_i32_23 : i32 to vector<16x1xi32>
    %49 = arith.cmpi eq, %14, %48 : vector<16x1xi32>
    %50 = vector.shape_cast %49 : vector<16x1xi1> to vector<16x1xi1>
    %51 = vector.broadcast %50 : vector<16x1xi1> to vector<16x32xi1>
    %52 = vector.shape_cast %46 : vector<1x32xf32> to vector<1x32xf32>
    %53 = vector.broadcast %52 : vector<1x32xf32> to vector<16x32xf32>
    %54 = arith.select %51, %53, %47 : vector<16x32xi1>, vector<16x32xf32>
    %55 = arith.addf %26, %54 : vector<16x32xf32>
    %c0_24 = arith.constant 0 : index
    %c0_25 = arith.constant 0 : index
    %c0_26 = arith.constant 0 : index
    %56 = vector.load %arg7[%c0_24, %c0_25, %c0_26] : memref<1x16x32xf32, #tpu.memory_space<vmem>>, vector<1x16x32xf32>
    %57 = vector.shape_cast %56 : vector<1x16x32xf32> to vector<16x32xf32>
    %58 = vector.shape_cast %55 : vector<16x32xf32> to vector<1x16x32xf32>
    tpu.vector_store %arg7[%c0_24, %c0_25, %c0_26], %58 {strides = array<i32>} : memref<1x16x32xf32, #tpu.memory_space<vmem>>, vector<1x16x32xf32>,
    return
  }
  func.func @transform_0(%arg0: i32, %arg1: i32) -> (i32, i32, i32) {
    %c0_i32 = arith.constant 0 : i32
    %c0_i32_0 = arith.constant 0 : i32
    return %arg0, %arg1, %c0_i32 : i32, i32, i32
  }
  func.func @transform_1(%arg0: i32, %arg1: i32) -> (i32, i32, i32) {
    %c2_i32 = arith.constant 2 : i32
    %0 = arith.muli %arg1, %c2_i32 : i32
    %c1_i32 = arith.constant 1 : i32
    %1 = arith.subi %0, %c1_i32 : i32
    %c0_i32 = arith.constant 0 : i32
    %2 = arith.maxsi %1, %c0_i32 : i32
    %c0_i32_0 = arith.constant 0 : i32
    %c0_i32_1 = arith.constant 0 : i32
    return %arg0, %2, %c0_i32_0 : i32, i32, i32
  }
  func.func @transform_2(%arg0: i32, %arg1: i32) -> (i32, i32) {
    %c0_i32 = arith.constant 0 : i32
    %c0_i32_0 = arith.constant 0 : i32
    %c0_i32_1 = arith.constant 0 : i32
    return %c0_i32, %c0_i32_0 : i32, i32
  }
  func.func @transform_3(%arg0: i32, %arg1: i32) -> (i32, i32) {
    %c0_i32 = arith.constant 0 : i32
    %c0_i32_0 = arith.constant 0 : i32
    %c0_i32_1 = arith.constant 0 : i32
    return %c0_i32, %c0_i32_0 : i32, i32
  }
  func.func @transform_4(%arg0: i32, %arg1: i32) -> (i32, i32) {
    %c0_i32 = arith.constant 0 : i32
    %c0_i32_0 = arith.constant 0 : i32
    %c0_i32_1 = arith.constant 0 : i32
    return %c0_i32, %c0_i32_0 : i32, i32
  }
  func.func @transform_5(%arg0: i32, %arg1: i32) -> (i32, i32, i32) {
    %c0_i32 = arith.constant 0 : i32
    %c0_i32_0 = arith.constant 0 : i32
    return %arg0, %arg1, %c0_i32 : i32, i32, i32
  }
}

</mosaic_0001>

<bundles_post_ra>
// kernel: tpu_custom_call.1
= control target key start
LH: loop header
LB: loop body
LE: loop exit
PB: predicated region body
PF: predicated region fallthrough
CT: control target
= control target key end

     0   :  { %s1947_s0 = inlined_call_operand.hbm [shape: f32[2,8,32], index: 0, kind: input, shape index: {}]   ;;  %s1948_s1 = inlined_call_operand.hbm [shape: f32[2,8,32], index: 1, kind: input, shape index: {}]   ;;  %s1949_s2 = inlined_call_operand.hbm [shape: f32[32,64], index: 2, kind: input, shape index: {}]   ;;  %s1950_s3 = inlined_call_operand.vmem [shape: f32[1,64], index: 3, kind: input, shape index: {}]   ;;  %s1951_s4 = inlined_call_operand.hbm [shape: f32[32,64], index: 4, kind: input, shape index: {}]   ;;  %s1952_s5 = inlined_call_operand.vmem [shape: f32[2,9,32], index: 5, kind: output, shape index: {}]  }
   0x1   :  { %1957 = sst [smem:[#allocation13_spill]] %s1947_s0 }
   0x2   :  { %1958 = sst [smem:[#allocation14_spill]] %s1949_s2 }
   0x3   :  { %10 = vsyncpa [#allocation3], 0 }
   0x4   :  { %12 = vsyncpa [#allocation3 + $0x1], 0 }
   0x5   :  { %13 = vsyncpa [#allocation5], 0 }
   0x6   :  { %15 = vsyncpa [#allocation5 + $0x1], 0 }
   0x7   :  { %16 = vsyncpa [#allocation8], 0  ;;  %s1646_s18 = smov 0   ;;  %s1648_s19 = smov 0  }
   0x8   :  { %s1650_s20 = smov 0   ;;  %s1652_s21 = smov 0  }
   0x9   :  { %s1654_s22 = smov 0   ;;  %s1656_s23 = smov 0  }
   0xa LB: > { %s1956_s24 = sadd.s32 4294967295, %s1596_s23   ;;  %s34_s25 = sadd.s32 1, %s1592_s22  ;;  %s1596_s23 = sphi %s1656_s23, %s22_s23   ;;  %s1592_s22 = sphi %s1654_s22, %s1975_s22   ;;  %s1588_s21 = sphi %s1652_s21, %s1974_s21   ;;  %s1584_s20 = sphi %s1650_s20, %s1973_s20   ;;  %s1580_s19 = sphi %s1648_s19, %s1972_s19   ;;  %s1576_s18 = sphi %s1646_s18, %s1971_s18  }
   0xb   : > { %p36_p0 = scmp.ge.s32.totalorder %s34_s25, 2  ;;  %s43_s26 = sadd.s32 1, %s1584_s20 }
   0xc   : > { %p50_p1 = scmp.ne.s32.totalorder %s1584_s20, %s1580_s19  ;;  %p51_p2 = scmp.eq.s32.totalorder %s1596_s23, 0 }
   0xd   : > { %s1977_s25 = smov (%p36_p0, %s34_s25), 0  ;;  %p56_p4 = scmp.ne.s32.totalorder %s1580_s19, %s1576_s18 }
   0xe   : > { %p1682_p3 = por %p51_p2, %p50_p1  ;;  %s38_s28 = ssub.s32 %s1592_s22, %s1977_s25 }
   0xf   : > { %p1691_p5 = scmp.eq.s32.totalorder %s1956_s24, 0  ;;  %p41_p6 = scmp.eq.s32.totalorder %s38_s28, 0 }
  0x10   : > { %p1227_p7 = scmp.ge.s32.totalorder %s1596_s23, 1  ;;  %p194_p9 = scmp.lt.s32.totalorder %s1596_s23, 3 }
  0x11   : > { %s1960_s29 = scalar_select %p1691_p5, 1, 0 }
  0x12   : > { %p1698_p8 = por %p1691_p5, %p56_p4  ;;  %p1706_p10 = pnand %p1227_p7, %p194_p9 }
  0x13   : > { %s1704_s6 = scalar_select %p41_p6, %s1584_s20, %s43_s26  }
  0x14   : > { %s1961_s30 = scalar_select %p1698_p8, 1, 0 }
  0x15   : > { %p1347_p11 = pneg %p1706_p10  ;;  %s1598_s8 = smov [#allocation6]  }
  0x16   : > { %s206_s9 = sshll.u32 %s1598_s8, 4  ;;  %s1599_s11 = smov [#allocation7]   ;;  %s207_s9 = int_to_ptr.vmem [resolvable:$true] %s206_s9 }
  0x17   : > { %p1714_p12 = pnand %p1347_p11, %p1691_p5  ;;  %s222_s12 = sshll.u32 %s1599_s11, 4  ;;  %s223_s12 = int_to_ptr.vmem [resolvable:$true] %s222_s12 }
  0x18   : > { %s1445_s13 = scalar_lea.vmem %s207_s9, 512  ;;  %p1453_p4 = scmp.lt.s32.totalorder %s207_s9, %s207_s9 }
  0x19   : > { %p1436_p13 = pneg %p1714_p12  ;;  %p1446_p0 = scmp.ne.s32.totalorder %s207_s9, %s1445_s13 }
  0x1a   : > { %p1454_p6 = scmp.lt.s32.totalorder %s1445_s13, %s1445_s13 }
  0x1b   : > { %p1448_p1 = pnand %p1446_p0, %p1436_p13 }
  0x1c   : > { %p1455_p7 = por %p1454_p6, %p1453_p4 }
  0x1d   : > { %p1449_p2 = pneg %p1448_p1 }
  0x1f   : > { %p1456_p9 = pnand %p1455_p7, %p1449_p2 }
  0x21   : > { %1459 = shalt.err (!%p1456_p9)
}
  0x22   : > { %s1600_s14 = smov 128   ;;  %s1601_s15 = smov 8  }
  0x23   : > { %s1964_s2 = sld [smem:[#allocation14_spill]]  ;;  %s1471_s18 = scalar_lea.vmem %s223_s12, 512 }
  0x24   : > { %p1472_p11 = scmp.ne.s32.totalorder %s223_s12, %s1471_s18  ;;  %p1479_p5 = scmp.lt.s32.totalorder %s223_s12, %s223_s12 }
  0x25   : > { %p1480_p8 = scmp.lt.s32.totalorder %s1471_s18, %s1471_s18 }
  0x26   : > { %p1474_p0 = pnand %p1472_p11, %p1436_p13 }
  0x27   : > { %p1481_p4 = por %p1480_p8, %p1479_p5 }
  0x28   : > { %p1475_p1 = pneg %p1474_p0 }
  0x29   : > { %1350 = dma.hbm_to_vmem [thread:$0]  (!%p1714_p12), %s1964_s2, 512, %s207_s9, [#allocation5], %s1600_s14, %s1600_s14, %s1601_s15  }
  0x2a   : > { %p1482_p2 = pnand %p1481_p4, %p1475_p1 }
  0x2c   : > { %1485 = shalt.err (!%p1482_p2)
}
  0x2d   : > { %1353 = dma.hbm_to_vmem [thread:$0]  (!%p1714_p12), %s1951_s4, 512, %s223_s12, [#allocation8], %s1600_s14, %s1600_s14, %s1601_s15  }
  0x2e   : > { %p1230_p6 = scmp.ge.s32.totalorder %s1596_s23, 2 }
  0x30   : > { %232 = sbr.rel (%p1230_p6) target bundleno = 87 (0x57), region = 28 }
  0x35   : > { %235 = sbr.rel (!%p1682_p3) target bundleno = 72 (0x48), region = 32  ;;  %s236_s8 = sand.u32 (%p1682_p3), 1, %s1584_s20  }
  0x36   : > { %s1231_s9 = sshll.u32 (%p1682_p3), %s236_s8, 4  ;;  %s237_s11 = scalar_lea.sflag (%p1682_p3), [#allocation3], %s236_s8 }
  0x37   : > { %s240_s13 = scalar_lea.vmem (%p1682_p3), [#allocation2], %s1231_s9 }
  0x3a   : > { %246 = vsyncadd %s237_s11, 128  ;;  %s1232_s16 = sshll.u32 %s1592_s22, 7  ;;  %s252_s17 = sshll.u32 %s240_s13, 4  ;;  %s253_s17 = int_to_ptr.vmem [resolvable:$true] %s252_s17 }
  0x3b   : > { %s1965_s0 = sld [smem:[#allocation13_spill]]  ;;  %s1496_s12 = scalar_lea.vmem %s253_s17, 128 }
  0x3c   : > { %p1497_p5 = scmp.ne.s32.totalorder %s253_s17, %s1496_s12  ;;  %s1602_s14 = smov [#allocation2]  }
  0x3d   : > { %s1498_s15 = sshll.u32 %s1602_s14, 4  ;;  %s1499_s15 = int_to_ptr.vmem [resolvable:$false] %s1498_s15 }
  0x3e   : > { %s1500_s28 = scalar_lea.vmem %s1499_s15, 512  ;;  %p1501_p8 = scmp.lt.s32.totalorder %s253_s17, %s1499_s15 }
  0x3f   : > { %p1502_p12 = scmp.lt.s32.totalorder %s1500_s28, %s1496_s12 }
  0x41   : > { %s250_s26 = scalar_lea.hbm %s1965_s0, %s1232_s16  ;;  %p1503_p13 = por %p1502_p12, %p1501_p8 }
  0x43   : > { %p1504_p7 = pnand %p1503_p13, %p1497_p5 }
  0x45   : > { %1507 = shalt.err (!%p1504_p7)
}
  0x46   : > { %s1603_s8 = smov 128   ;;  %s1604_s9 = smov 8  }
  0x47   : > { %258 = dma.hbm_to_vmem [thread:$0]  %s250_s26, 128, %s253_s17, %s237_s11, %s1603_s8, %s1603_s8, %s1604_s9  }
  0x48 PF: > { %s262_s13 = sand.u32 1, %s1596_s23   ;;  %s264_s16 = sand.u32 1, %s1584_s20  }
  0x49   : > { %s1233_s10 = sshll.u32 %s264_s16, 3  ;;  %s1234_s18 = sshll.u32 %s1592_s22, 7 }
  0x4a   : > { %s276_s15 = scalar_lea.hbm %s1948_s1, %s1234_s18  ;;  %s266_s12 = scalar_lea.vmem [#allocation4], %s1233_s10 }
  0x4b   : > { %s278_s28 = sshll.u32 %s266_s12, 4  ;;  %s263_s0 = scalar_lea.sflag [#allocation5], %s262_s13  ;;  %s279_s28 = int_to_ptr.vmem [resolvable:$true] %s278_s28 }
  0x4c   : > { %s1520_s2 = scalar_lea.vmem %s279_s28, 128  ;;  %s1605_s11 = smov [#allocation4]  }
  0x4d   : > { %p1521_p9 = scmp.ne.s32.totalorder %s279_s28, %s1520_s2  ;;  %s1524_s17 = sshll.u32 %s1605_s11, 4  ;;  %s1525_s17 = int_to_ptr.vmem [resolvable:$false] %s1524_s17 }
  0x4e   : > { %s1526_s26 = scalar_lea.vmem %s1525_s17, 256  ;;  %p1527_p1 = scmp.lt.s32.totalorder %s279_s28, %s1525_s17 }
  0x4f   : > { %p1522_p11 = pnand %p1521_p9, %p1682_p3  ;;  %p1528_p4 = scmp.lt.s32.totalorder %s1526_s26, %s1520_s2 }
  0x51   : > { %p1523_p0 = pneg %p1522_p11  ;;  %p1529_p2 = por %p1528_p4, %p1527_p1 }
  0x53   : > { %p1530_p6 = pnand %p1529_p2, %p1523_p0 }
  0x55   : > { %1533 = shalt.err (!%p1530_p6)
}
  0x56   : > { %1340 = dma.hbm_to_vmem [thread:$0]  (%p1682_p3), %s276_s15, 128, %s279_s28, %s263_s0  }
  0x57 PF: > { %287 = sbr.rel (%p1706_p10) target bundleno = 1059 (0x423), region = 40  ;;  %s289_s24 = sand.u32 (!%p1706_p10), 1, %s1580_s19  }
  0x58   : > { %s1236_s8 = sshll.u32 (!%p1706_p10), %s289_s24, 4  ;;  %s290_s9 = scalar_lea.sflag (!%p1706_p10), [#allocation3], %s289_s24 }
  0x59   : > { %s293_s13 = scalar_lea.vmem (!%p1706_p10), [#allocation2], %s1236_s8  ;;  %p1966_p5 = scmp.ne.s32.totalorder (!%p1706_p10), %s1961_s30, 0 }
  0x5c   : > { %1559 = dma.done.wait (%p1966_p5), %s290_s9, 256  }
  0x5d   : > { %1561 = vsyncadd (%p1966_p5), %s290_s9, 4294967040  ;;  %s1967_s2 = sadd.s32 4294967295, %s1596_s23   ;;  %s1237_s0 = sshll.u32 %s289_s24, 3 }
  0x5e   : > { %s298_s27 = sand.u32 1, %s1967_s2   ;;  %s1763_s10 = scalar_lea.vmem [#allocation4], %s1237_s0 }
  0x5f   : > { %s299_s16 = scalar_lea.sflag [#allocation5], %s298_s27 }
  0x60   : > { %1563 = dma.done.wait (%p1966_p5), %s299_s16, 128  }
  0x61   : > { %1565 = vsyncadd (%p1966_p5), %s299_s16, 4294967168  ;;  %p1968_p3 = scmp.ne.s32.totalorder %s1960_s29, 0 }
  0x63   : > { %1567 = dma.done.wait (%p1968_p3), [#allocation5], 512  }
  0x64   : > { %1569 = vsyncadd (%p1968_p3), [#allocation5], 4294966784 }
  0x65   : > { %1571 = dma.done.wait (%p1968_p3), [#allocation8], 512  }
  0x66   : > { %1573 = vsyncadd (%p1968_p3), [#allocation8], 4294966784  ;;  %vm376_vm0 = vcmask 261120   ;;  %v368_v0 = vld [vmem:[#allocation6 + $0x18] sm:$0xff]  ;;  %v367_v1 = vld [vmem:[#allocation6 + $0x10] sm:$0xff]  ;;  %v1606_v6 = vmov 0.0   ;;  %v371_v11 = vlaneseq }
  0x67   : > { %1284 = vmatprep.subr.mxu0 %v368_v0  ;;  %v363_v2 = vld [vmem:[%s293_s13] sm:$0xff]  ;;  %v366_v3 = vld [vmem:[#allocation6 + $0x8] sm:$0xff]  ;;  %vm1607_vm1 = vmmov 0   ;;  %v1787_v8 = vld [vmem:[#allocation7 + $0x18] sm:$0xff]  ;;  %v1608_v31 = vmov 683565275  }
  0x68   : > { %1285 = vmatpush3.msra.mxu0 %v368_v0  ;;  %1292 = vmatprep.mubr.msk.f32.mxu0 %vm376_vm0, %v363_v2  ;;  %v365_v4 = vld [vmem:[#allocation6] sm:$0xff]  ;;  %v364_v5 = vld [vmem:[%s293_s13 + $0x8] sm:$0xff]  ;;  %v780_v7 = vld [vmem:[%s1763_s10 + $0x7] sm:$0x1]  ;;  %v1799_v12 = vshrl.u32 %v371_v11, 7  ;;  %s1614_s7 = smov 96  }
  0x69   : > { %1286 = vmatprep.subr.mxu0 %v367_v1  ;;  %v1789_v9 = vld [vmem:[#allocation7 + $0x10] sm:$0xff]  ;;  %1295 = vmatprep.subr.mxu1 %v1787_v8  ;;  %v1793_v10 = vld [vmem:[#allocation7 + $0x8] sm:$0xff]  ;;  %v1609_v33 = vmov 2475754826   ;;  %v1610_v36 = vmov 2131351028  }
  0x6a   : > { %1287 = vmatpush3.msra.mxu0 %v367_v1  ;;  %1296 = vmatpush3.msra.mxu1 %v1787_v8  ;;  %v373_v13 = vsub.s32 0, %v1799_v12  ;;  %v1805_v14 = vld [vmem:[%s1950_s3] sm:$0x1]  ;;  %v1611_v39 = vmov 2102212464   ;;  %s1615_s18 = smov 32  }
  0x6b   : > { %1288 = vmatprep.subr.mxu0 %v366_v3  ;;  %1297 = vmatprep.subr.mxu1 %v1789_v9  ;;  %v1612_v42 = vmov 920167782   ;;  %v1613_v45 = vmov 1326507024   ;;  %p354_p10 = scmp.lt.s32.totalorder %s1588_s21, 1 }
  0x6c   : > { %1289 = vmatpush3.msra.mxu0 %v366_v3  ;;  %1298 = vmatpush3.msra.mxu1 %v1789_v9  ;;  %v374_v15 = vrot.slane %v1805_v14, %v373_v13 }
  0x6d   : > { %1290 = vmatprep.subr.mxu0 %v365_v4  ;;  %1299 = vmatprep.subr.mxu1 %v1793_v10  ;;  %s1979_s21 = smov (!%p354_p10, %s1588_s21), 1 }
  0x6e   : > { %1291 = vmatpush3.msra.mxu0 %v365_v4  ;;  %1300 = vmatpush3.msra.mxu1 %v1793_v10  ;;  %s1261_s14 = sshll.u32 %s1979_s21, 4 }
  0x6f   : > { %1293 = vmatmul.mubr.msk.f32.vlgmr.msra.gmra.mxu0 %vm376_vm0, %v364_v5  ;;  %1306 = vmatprep.subr.mxu0 %v1606_v6  ;;  %s361_s28 = scalar_lea.vmem %s1952_s5, %s1261_s14 }
  0x70   : > { %1307 = vmatpush3.msra.mxu0 %v368_v0  ;;  %1314 = vmatprep.mubr.msk.f32.mxu0 %vm1607_vm1, %v1606_v6 }
  0x71   : > { %1308 = vmatprep.subr.mxu0 %v1606_v6 }
  0x72   : > { %1309 = vmatpush3.msra.mxu0 %v367_v1 }
  0x73   : > { %1310 = vmatprep.subr.mxu0 %v1606_v6 }
  0x74   : > { %1311 = vmatpush3.msra.mxu0 %v366_v3 }
  0x75   : > { %1312 = vmatprep.subr.mxu0 %v1606_v6 }
  0x76   : > { %1313 = vmatpush3.msra.mxu0 %v365_v4 }
  0x77   : > { %1315 = vmatmul.mubr.msk.f32.vlgmr.msra.gmra.mxu0 %vm376_vm0, %v780_v7 }
 0x12f   : > { %v1294_v16 = vpop.f32.mrf.mxu0 }
 0x131   : > { %v449_v17 = vpop.f32.mrf.mxu0 }
 0x132   : > { %v1810_v18 = vadd.f32 %v449_v17, %v374_v15 }
 0x134   : > { %v467_v19 = vand.u32 2139095040, %v1810_v18  ;;  %v464_v25 = vand.u32 2147483647, %v1810_v18  ;;  %vm466_vm10 = vcmp.lt.s32.totalorder %v1810_v18, 0 }
 0x136   : > { %v468_v20 = vshrl.u32 %v467_v19, 23  ;;  %v471_v29 = vand.u32 8388607, %v464_v25  ;;  %vm1844_vm11 = vcmp.le.f32.partialorder %v464_v25, 0.7853982 }
 0x137   : > { %v850_v21 = vpop.f32.mrf.mxu0 }
 0x138   : > { %v1244_v22 = vadd.s32 4294967169, %v468_v20  ;;  %v472_v47 = vor.u32 8388608, %v471_v29  ;;  %v1837_v19 = vadd.f32 %v850_v21, %v1805_v14 }
 0x139   : > { %v1316_v23 = vpop.f32.mrf.mxu0 }
 0x13a   : > { %v474_v24 = vadd.s32 1, %v1244_v22  ;;  %v512_v61 = vshll.u32 %v472_v47, 8  ;;  %v860_v23 = vand.u32 2139095040, %v1837_v19 }
 0x13c   : > { %vm475_vm2 = vcmp.gt.s32.totalorder %v474_v24, 0 }
 0x13d   : > { %v476_v26 = vsel %vm475_vm2, %v474_v24, 0 }
 0x13e   : > { %v478_v27 = vand.u32 31, %v476_v26  ;;  %v477_v30 = vshrl.u32 %v476_v26, 5 }
 0x140   : > { %v479_v28 = vsub.s32 32, %v478_v27  ;;  %v481_v32 = vshll.u32 %v1608_v31, %v478_v27  ;;  %v484_v34 = vshll.u32 %v1609_v33, %v478_v27  ;;  %v487_v38 = vshll.u32 %v1610_v36, %v478_v27 }
 0x141   : > { %v490_v41 = vshll.u32 %v1611_v39, %v478_v27  ;;  %v493_v44 = vshll.u32 %v1612_v42, %v478_v27  ;;  %vm496_vm3 = vcmp.lt.s32.totalorder %v477_v30, 1  ;;  %vm499_vm4 = vcmp.lt.s32.totalorder %v477_v30, 4 }
 0x142   : > { %v482_v35 = vshrl.u32 %v1609_v33, %v479_v28  ;;  %v485_v37 = vshrl.u32 %v1610_v36, %v479_v28  ;;  %v488_v40 = vshrl.u32 %v1611_v39, %v479_v28  ;;  %v491_v43 = vshrl.u32 %v1612_v42, %v479_v28 }
 0x143   : > { %v494_v46 = vshrl.u32 %v1613_v45, %v479_v28  ;;  %v480_v56 = vshrl.u32 %v1608_v31, %v479_v28  ;;  %vm498_vm5 = vcmp.lt.s32.totalorder %v477_v30, 3  ;;  %vm497_vm6 = vcmp.lt.s32.totalorder %v477_v30, 2 }
 0x144   : > { %v483_v48 = vor.u32 %v482_v35, %v481_v32  ;;  %v486_v49 = vor.u32 %v485_v37, %v484_v34  ;;  %v489_v50 = vor.u32 %v488_v40, %v487_v38  ;;  %v492_v51 = vor.u32 %v491_v43, %v490_v41 }
 0x145   : > { %v495_v52 = vor.u32 %v494_v46, %v493_v44  ;;  %v861_v27 = vshrl.u32 %v860_v23, 23 }
 0x146   : > { %v501_v53 = vsel %vm499_vm4, %v489_v50, 2102212464  ;;  %v504_v54 = vsel %vm496_vm3, %v483_v48, %v486_v49  ;;  %v508_v55 = vsel %vm496_vm3, %v486_v49, %v489_v50  ;;  %v505_v57 = vsel %vm499_vm4, %v492_v51, 920167782 }
 0x147   : > { %v509_v58 = vsel %vm499_vm4, %v495_v52, 1326507024  ;;  %v506_v59 = vsel %vm498_vm5, %v489_v50, %v505_v57  ;;  %v500_v62 = vsel %vm496_vm3, %v480_v56, %v483_v48  ;;  %v502_v63 = vsel %vm498_vm5, %v486_v49, %v501_v53 }
 0x148   : > { %v510_v60 = vsel %vm498_vm5, %v492_v51, %v509_v58  ;;  %v507_v0 = vsel %vm497_vm6, %v504_v54, %v506_v59  ;;  %v503_v7 = vsel %vm497_vm6, %v500_v62, %v502_v63  ;;  %v1254_v30 = vadd.s32 4294967169, %v861_v27 }
 0x149   : > { %v511_v1 = vsel %vm497_vm6, %v508_v55, %v510_v60  ;;  %v1830_v4 = vmul.u32.u64.low %v512_v61, %v507_v0  ;;  %v1831_v5 = vmul.u32.u64.high %v512_v61, %v507_v0, %v1830_v4  ;;  %v519_v15 = vmul.u32 %v512_v61, %v503_v7 }
 0x14a   : > { %v1827_v2 = vmul.u32.u64.low %v512_v61, %v511_v1  ;;  %v1828_v3 = vmul.u32.u64.high %v512_v61, %v511_v1, %v1827_v2  ;;  %v867_v35 = vadd.s32 1, %v1254_v30  ;;  %v857_v59 = vand.u32 2147483647, %v1837_v19 }
 0x14b   : > { %v522_v11 = vadd.s32 1, %v1831_v5  ;;  %vm556_vm6 = vweird.f32 %v1810_v18 }
 0x14c   : > { %vm521_vm7 = vc.u32 %v1828_v3, %v1830_v4  ;;  %v520_v38 = vadd.s32 %v1830_v4, %v1828_v3  ;;  %vm868_vm9 = vcmp.gt.s32.totalorder %v867_v35, 0  ;;  %v864_v25 = vand.u32 8388607, %v857_v59 }
 0x14d   : > { %v523_v16 = vsel %vm521_vm7, %v522_v11, %v1831_v5  ;;  %v869_v47 = vsel %vm868_vm9, %v867_v35, 0  ;;  %vm858_vm9 = vcmp.le.f32.partialorder %v857_v59, 0.7853982 }
 0x14e   : > { %v524_v17 = vadd.s32 %v523_v16, %v519_v15  ;;  %v871_v49 = vand.u32 31, %v869_v47  ;;  %v870_v58 = vshrl.u32 %v869_v47, 5  ;;  %v865_v5 = vor.u32 8388608, %v864_v25 }
 0x150   : > { %v525_v20 = vadd.s32 536870912, %v524_v17  ;;  %v872_v54 = vsub.s32 32, %v871_v49  ;;  %v883_v62 = vshll.u32 %v1611_v39, %v871_v49  ;;  %v874_v0 = vshll.u32 %v1608_v31, %v871_v49 }
 0x151   : > { %v877_v2 = vshll.u32 %v1609_v33, %v871_v49  ;;  %v880_v4 = vshll.u32 %v1610_v36, %v871_v49  ;;  %vm889_vm12 = vcmp.lt.s32.totalorder %v870_v58, 1  ;;  %vm890_vm13 = vcmp.lt.s32.totalorder %v870_v58, 2 }
 0x152   : > { %v526_v22 = vshrl.u32 %v525_v20, 30  ;;  %v884_v63 = vshrl.u32 %v1612_v42, %v872_v54  ;;  %v875_v1 = vshrl.u32 %v1609_v33, %v872_v54  ;;  %v878_v3 = vshrl.u32 %v1610_v36, %v872_v54 }
 0x153   : > { %v881_v11 = vshrl.u32 %v1611_v39, %v872_v54  ;;  %v887_v20 = vshrl.u32 %v1613_v45, %v872_v54  ;;  %vm891_vm14 = vcmp.lt.s32.totalorder %v870_v58, 3  ;;  %vm892_vm15 = vcmp.lt.s32.totalorder %v870_v58, 4 }
 0x154   : > { %v527_v24 = vshll.u32 %v526_v22, 30  ;;  %v550_v53 = vsub.s32 4, %v526_v22  ;;  %v876_v7 = vor.u32 %v875_v1, %v874_v0  ;;  %v885_v15 = vor.u32 %v884_v63, %v883_v62 }
 0x155   : > { %v879_v16 = vor.u32 %v878_v3, %v877_v2  ;;  %v905_v36 = vshll.u32 %v865_v5, 8  ;;  %v873_v45 = vshrl.u32 %v1608_v31, %v872_v54 }
 0x156   : > { %v528_v26 = vsub.s32 %v524_v17, %v527_v24  ;;  %v551_v60 = vsel %vm466_vm10, %v550_v53, %v526_v22  ;;  %v886_v17 = vshll.u32 %v1612_v42, %v871_v49  ;;  %v882_v22 = vor.u32 %v881_v11, %v880_v4  ;;  %v1869_v42 = vld [vmem:[#allocation7] sm:$0xff] }
 0x157   : > { %v897_v23 = vsel %vm889_vm12, %v876_v7, %v879_v16  ;;  %v898_v24 = vsel %vm892_vm15, %v885_v15, 920167782  ;;  %v553_v27 = vsel %vm1844_vm11, 0, %v551_v60  ;;  %1301 = vmatprep.subr.mxu1 %v1869_v42 }
 0x158   : > { %v530_v28 = vsub.s32 0, %v528_v26  ;;  %v888_v33 = vor.u32 %v887_v20, %v886_v17  ;;  %v901_v39 = vsel %vm889_vm12, %v879_v16, %v882_v22  ;;  %v894_v30 = vsel %vm892_vm15, %v882_v22, 2102212464  ;;  %1302 = vmatpush3.msra.mxu1 %v1869_v42 }
 0x159   : > { %1317 = vmatprep.subr.mxu1 %v1606_v6 }
 0x15a   : > { %v1245_v29 = vmin.u32 %v530_v28, %v528_v26 }
 0x15c   : > { %v532_v32 = vclz %v1245_v29  ;;  %v902_v29 = vsel %vm892_vm15, %v888_v33, 1326507024 }
 0x15e   : > { %v1246_v34 = vadd.s32 4294967294, %v532_v32  ;;  %v903_v32 = vsel %vm891_vm14, %v885_v15, %v902_v29 }
 0x160   : > { %vm1247_vm8 = vcmp.lt.s32.totalorder %v1246_v34, 0 }
 0x161   : > { %v535_v37 = vsel %vm1247_vm8, 0, %v1246_v34  ;;  %vm859_vm8 = vcmp.lt.s32.totalorder %v1837_v19, 0 }
 0x162   : > { %v536_v40 = vsub.s32 32, %v535_v37  ;;  %v540_v14 = vsub.s32 4294967266, %v535_v37  ;;  %v537_v21 = vshll.u32 %v528_v26, %v535_v37  ;;  %v899_v26 = vsel %vm891_vm14, %v882_v22, %v898_v24 }
 0x163   : > { %v900_v28 = vsel %vm890_vm13, %v897_v23, %v899_v26  ;;  %v893_v37 = vsel %vm889_vm12, %v873_v45, %v876_v7 }
 0x164   : > { %v538_v41 = vshrl.u32 %v520_v38, %v536_v40  ;;  %v541_v43 = vadd.s32 127, %v540_v14  ;;  %v1875_v34 = vmul.u32.u64.low %v905_v36, %v900_v28  ;;  %v1876_v35 = vmul.u32.u64.high %v905_v36, %v900_v28, %v1875_v34 }
 0x165   : > { %v895_v38 = vsel %vm891_vm14, %v879_v16, %v894_v30  ;;  %v904_v40 = vsel %vm890_vm13, %v901_v39, %v903_v32  ;;  %v557_v14 = vand.u32 3, %v553_v27  ;;  %vm1056_vm14 = vcmp.eq.s32.totalorder %v1799_v12, 0 }
 0x166   : > { %v539_v44 = vor.u32 %v538_v41, %v537_v21  ;;  %v542_v46 = vshll.u32 %v541_v43, 23  ;;  %v896_v31 = vsel %vm890_vm13, %v893_v37, %v895_v38  ;;  %v915_v43 = vadd.s32 1, %v1876_v35 }
 0x167   : > { %v1884_v21 = vmul.u32.u64.low %v905_v36, %v904_v40  ;;  %v1885_v41 = vmul.u32.u64.high %v905_v36, %v904_v40, %v1884_v21  ;;  %vm562_vm2 = vcmp.eq.s32.totalorder %v557_v14, 2  ;;  %vm559_vm4 = vcmp.eq.s32.totalorder %v557_v14, 0 }
 0x168   : > { %v543_v48 = vor.u32 4788187, %v542_v46  ;;  %v546_v51 = vcvt.s32.f32 %v539_v44  ;;  %v912_v46 = vmul.u32 %v905_v36, %v896_v31  ;;  %vm558_vm5 = vcmp.lt.s32.totalorder %v557_v14, 2 }
 0x169   : > { %vm914_vm3 = vc.u32 %v1885_v41, %v1875_v34  ;;  %v913_v0 = vadd.s32 %v1875_v34, %v1885_v41  ;;  %vm949_vm13 = vweird.f32 %v1837_v19  ;;  %v458_v37 = vmin.f32 %v1810_v18, 4.6051702 }
 0x16a   : > { %v544_v50 = vand.u32 2147483647, %v543_v48 }
 0x16b   : > { %v460_v38 = vmul.f32 1.442695, %v458_v37 }
 0x16c   : > { %v547_v52 = vmul.f32 %v546_v51, %v544_v50  ;;  %v916_v51 = vsel %vm914_vm3, %v915_v43, %v1876_v35 }
 0x16d   : > { %v917_v53 = vadd.s32 %v916_v51, %v912_v46  ;;  %v1065_v51 = vrot.slane %v1606_v6, %v373_v13 }
 0x16e   : > { %v548_v55 = vxor.u32 2147483648, %v547_v52 }
 0x16f   : > { %v918_v56 = vadd.s32 536870912, %v917_v53 }
 0x170   : > { %v549_v57 = vsel %vm466_vm10, %v548_v55, %v547_v52 }
 0x171   : > { %v552_v61 = vsel %vm1844_vm11, %v1810_v18, %v549_v57  ;;  %v919_v57 = vshrl.u32 %v918_v56, 30  ;;  %v854_v18 = vmin.f32 %v1837_v19, 4.6051702 }
 0x172   : > { %1422 = vcosq.f32 %v552_v61 }
 0x173   : > { %1424 = vsinq.f32 %v552_v61  ;;  %v920_v58 = vshll.u32 %v919_v57, 30  ;;  %v943_v24 = vsub.s32 4, %v919_v57  ;;  %v855_v21 = vmul.f32 1.442695, %v854_v18 }
 0x175   : > { %v921_v60 = vsub.s32 %v917_v53, %v920_v58  ;;  %v944_v26 = vsel %vm859_vm8, %v943_v24, %v919_v57 }
 0x176   : > { %v946_v39 = vsel %vm858_vm9, 0, %v944_v26 }
 0x177   : > { %v923_v61 = vsub.s32 0, %v921_v60  ;;  %v950_v27 = vand.u32 3, %v946_v39 }
 0x179   : > { %v1255_v62 = vmin.u32 %v923_v61, %v921_v60  ;;  %vm955_vm10 = vcmp.eq.s32.totalorder %v950_v27, 2  ;;  %vm952_vm11 = vcmp.eq.s32.totalorder %v950_v27, 0  ;;  %vm951_vm12 = vcmp.lt.s32.totalorder %v950_v27, 2 }
 0x17b   : > { %v925_v63 = vclz %v1255_v62 }
 0x17d   : > { %v1256_v25 = vadd.s32 4294967294, %v925_v63 }
 0x17f   : > { %v1423_v44 = vpop.eup %1422  ;;  %vm1257_vm7 = vcmp.lt.s32.totalorder %v1256_v25, 0 }
 0x180   : > { %v1425_v47 = vpop.eup %1424  ;;  %v563_v48 = vxor.u32 2147483648, %v1423_v44  ;;  %v928_v1 = vsel %vm1257_vm7, 0, %v1256_v25 }
 0x181   : > { %v560_v49 = vxor.u32 2147483648, %v1425_v47  ;;  %v929_v2 = vsub.s32 32, %v928_v1  ;;  %v930_v3 = vshll.u32 %v921_v60, %v928_v1  ;;  %v933_v4 = vsub.s32 4294967266, %v928_v1 }
 0x182   : > { %v564_v50 = vsel %vm562_vm2, %v563_v48, %v1425_v47 }
 0x183   : > { %v561_v52 = vsel %vm559_vm4, %v1423_v44, %v560_v49  ;;  %v931_v5 = vshrl.u32 %v913_v0, %v929_v2  ;;  %v934_v7 = vadd.s32 127, %v933_v4 }
 0x184   : > { %v565_v54 = vsel %vm558_vm5, %v561_v52, %v564_v50 }
 0x185   : > { %v566_v55 = vsel %vm556_vm6, nan, %v565_v54  ;;  %v932_v11 = vor.u32 %v931_v5, %v930_v3  ;;  %v935_v15 = vshll.u32 %v934_v7, 23 }
 0x186   : > { %672 = vrot.lane.b32.xlu0 %v566_v55, %s1614_s7 }
 0x187   : > { %v936_v16 = vor.u32 4788187, %v935_v15  ;;  %v939_v17 = vcvt.s32.f32 %v932_v11 }
 0x189   : > { %v937_v20 = vand.u32 2147483647, %v936_v16 }
 0x18b   : > { %v940_v22 = vmul.f32 %v939_v17, %v937_v20 }
 0x18d   : > { %v941_v33 = vxor.u32 2147483648, %v940_v22 }
 0x18f   : > { %v942_v23 = vsel %vm859_vm8, %v941_v33, %v940_v22 }
 0x190   : > { %v945_v36 = vsel %vm858_vm9, %v1837_v19, %v942_v23 }
 0x191   : > { %1426 = vcosq.f32 %v945_v36 }
 0x192   : > { %1428 = vsinq.f32 %v945_v36 }
 0x193   : > { %1430 = vpow2.f32 %v460_v38 }
 0x194   : > { %1432 = vpow2.f32 %v855_v21 }
 0x19e   : > { %v1427_v45 = vpop.eup %1426 }
 0x19f   : > { %v1429_v28 = vpop.eup %1428  ;;  %v956_v29 = vxor.u32 2147483648, %v1427_v45 }
 0x1a0   : > { %v953_v30 = vxor.u32 2147483648, %v1429_v28  ;;  %v1431_v40 = vpop.eup %1430 }
 0x1a1   : > { %v957_v59 = vsel %vm955_vm10, %v956_v29, %v1429_v28 }
 0x1a2   : > { %v954_v32 = vsel %vm952_vm11, %v1427_v45, %v953_v30 }
 0x1a3   : > { %v958_v34 = vsel %vm951_vm12, %v954_v32, %v957_v59 }
 0x1a4   : > { %v959_v35 = vsel %vm949_vm13, nan, %v958_v34 }
 0x1a5   : > { %961 = vrot.lane.b32.xlu0 %v959_v35, %s1614_s7 }
 0x1f8   : > { %v673_v31 = vpop.permute.xlu0 %672 }
 0x1f9   : > { %v678_v14 = vmul.f32 %v1431_v40, %v673_v31 }
 0x1fb   : > { %1303 = vmatprep.mubr.msk.f32.mxu1 %vm376_vm0, %v678_v14 }
 0x1fc   : > { %1304 = vmatmul.mubr.f32.vlgmr.msra.gmra.mxu1 %v1606_v6 }
 0x1fd   : > { %1318 = vmatpush3.msra.mxu1 %v1787_v8  ;;  %1325 = vmatprep.mubr.msk.f32.mxu1 %vm1607_vm1, %v1606_v6  ;;  %v1433_v8 = vpop.eup %1432  ;;  %vm1053_vm1 = vcmp.lt.s32.totalorder %v1799_v12, 1 }
 0x1fe   : > { %1319 = vmatprep.subr.mxu1 %v1606_v6 }
 0x1ff   : > { %1320 = vmatpush3.msra.mxu1 %v1789_v9 }
 0x200   : > { %1321 = vmatprep.subr.mxu1 %v1606_v6 }
 0x201   : > { %1322 = vmatpush3.msra.mxu1 %v1793_v10 }
 0x202   : > { %1323 = vmatprep.subr.mxu1 %v1606_v6 }
 0x203   : > { %1324 = vmatpush3.msra.mxu1 %v1869_v42 }
 0x217   : > { %v962_v41 = vpop.permute.xlu0 %961 }
 0x218   : > { %v964_v43 = vmul.f32 %v1433_v8, %v962_v41 }
 0x21a   : > { %1326 = vmatmul.mubr.msk.f32.vlgmr.msra.gmra.mxu1 %vm376_vm0, %v964_v43 }
 0x2bc   : > { %v1305_v44 = vpop.f32.mrf.mxu1 }
 0x2be   : > { %v771_v46 = vpop.f32.mrf.mxu1 }
 0x2bf   : > { %1045 = vrot.lane.b32.xlu1 %v771_v46, %s1614_s7 }
 0x2c3   : > { %1047 = vrot.lane.b32.xlu1 %v1305_v44, %s1614_s7 }
 0x2da   : > { %v1034_v9 = vpop.f32.mrf.mxu1 }
 0x2dc   : > { %v1327_v10 = vpop.f32.mrf.mxu1 }
 0x331   : > { %v1046_v47 = vpop.permute.xlu1 %1045 }
 0x332   : > { %v1051_v19 = vrot.slane %v1046_v47, 7 }
 0x335   : > { %v1048_v48 = vpop.permute.xlu1 %1047 }
 0x336   : > { %v1052_v42 = vrot.slane %v1048_v48, 7 }
 0x338   : > { %v1055_v49 = vsel %vm1053_vm1, %v1052_v42, %v1051_v19  ;;  %v1054_v50 = vsel %vm1053_vm1, %v1051_v19, %v1052_v42 }
 0x339   : > { %1068 = vrot.lane.b32.xlu0 %v1055_v49, %s1615_s18  ;;  %1070 = vrot.lane.b32.xlu1 %v1054_v50, %s1615_s18 }
 0x3ab   : > { %v1069_v52 = vpop.permute.xlu0 %1068  ;;  %v1071_v53 = vpop.permute.xlu1 %1070 }
 0x3ac   : > { %1080 = vrot.lane.b32.xlu1 %v1071_v53, %s1614_s7  ;;  %v1074_v54 = vsel %vm1056_vm14, %v1065_v51, %v1069_v52 }
 0x3ad   : > { %1078 = vrot.lane.b32.xlu0 %v1074_v54, %s1614_s7 }
 0x41e   : > { %v1081_v55 = vpop.permute.xlu1 %1080 }
 0x41f   : > { %v1085_v56 = vadd.f32 %v1305_v44, %v1081_v55  ;;  %v1079_v57 = vpop.permute.xlu0 %1078 }
 0x420   : > { %v1084_v6 = vadd.f32 %v1079_v57, %v771_v46 }
 0x421   : > { %1087 = vst.msk [vmem:[%s361_s28 + $0x8] sm:$0xff] %vm376_vm0, %v1085_v56 }
 0x422   : > { %1086 = vst.msk [vmem:[%s361_s28] sm:$0xff] %vm376_vm0, %v1084_v6 }
 0x423 PF: > { %s22_s23 = sadd.s32 1, %s1596_s23   ;;  %s1971_s18 = smov %s1580_s19 }
 0x424   : > { %p19_p8 = scmp.ge.s32.totalorder %s22_s23, 4   ;;  %s1972_s19 = smov %s1584_s20 }
 0x425   : > { %s1973_s20 = smov %s1704_s6  ;;  %s1974_s21 = smov %s1592_s22 }
 0x426   : > { %s1975_s22 = smov %s1977_s25  ;;  %21 = sbr.rel (!%p19_p8) target bundleno = 10 (0xa), region = 101 }
 0x42b   :  { %1118 = vsyncpa [#allocation3], 1 }
 0x42c   :  { %1120 = vsyncpa [#allocation3 + $0x1], 1 }
 0x42d   :  { %1121 = vsyncpa [#allocation5], 1 }
 0x42e   :  { %1123 = vsyncpa [#allocation5 + $0x1], 1 }
 0x42f   :  { %1124 = vsyncpa [#allocation8], 1 }

</bundles_post_ra>
